<compile_context>
chip_gen: v6e
topology: v6e:2x2x1
jax: 0.10.0
libtpu: 0.0.40
codegen_flags: <defaults>
</compile_context>

<pallas_src>
import functools

import jax
import jax.numpy as jnp
from jax.experimental import pallas as pl
from jax.experimental.pallas import tpu as pltpu

LANE = 128  # TPU lane width: D's scalar logits are written as a lane-dense slab.

# Tile-size preferences (first divisor of the dim wins, else full extent).
TM_PREF = (256, 128, 64, 32, 16, 8)
TN_PREF = (512, 256, 128)
TK_PREF = (512, 256, 1024, 128)   # 512 first: safe on v7x's 64 MiB VMEM


def _pick_tile(dim, preferred):
    for t in preferred:
        if dim >= t and dim % t == 0:
            return t
    return dim  # full extent (always legal for a BlockSpec)


def _pick_tile_m(m, preferred=TM_PREF):
    tm = _pick_tile(m, preferred)
    # v7x megacore: make sure the "parallel" M axis has >=2 blocks so both
    # TensorCores get work (only when the halved tile is still sublane-legal).
    if m // tm == 1 and tm >= 16 and (tm // 2) % 8 == 0:
        tm //= 2
    return tm


def _vmem_limit(bytes_needed):
    # Explicit scoped-VMEM budget: above v5e's 16 MiB default, below v7x's
    # 64 MiB physical per-TensorCore VMEM, with ~2x headroom over the estimate.
    return int(min(48 << 20, max(32 << 20, 2 * bytes_needed)))


# --------------------------------------------------------------------------
# G: one lane-dense class-conditional linear ([z|e] @ [Wz;We]) + tanh epilogue.
# bf16 operands, f32 accumulation, bf16 output (halves the G_z HBM round-trip).
# --------------------------------------------------------------------------
def _g_linear_kernel(zin_ref, w_ref, b_ref, o_ref):
    acc = jnp.dot(zin_ref[...], w_ref[...], preferred_element_type=jnp.float32)
    acc = acc + b_ref[...]
    o_ref[...] = jnp.tanh(acc).astype(o_ref.dtype)   # EUP tanh, cast at store


def g_linear(g_in, w, b):
    M, Kp = g_in.shape
    N = w.shape[1]
    tm = _pick_tile_m(M)
    tn = _pick_tile(N, TN_PREF)
    # Weights outer, batch inner: each (Kp, tn) weight tile stays VMEM-resident
    # across the whole batch sweep instead of being re-streamed per M tile.
    grid = (N // tn, M // tm)
    bytes_needed = 2 * (tm * Kp * 2 + Kp * tn * 2 + tn * 4 + tm * tn * 2)
    return pl.pallas_call(
        _g_linear_kernel,
        out_shape=jax.ShapeDtypeStruct((M, N), jnp.bfloat16),
        grid_spec=pltpu.PrefetchScalarGridSpec(
            num_scalar_prefetch=0,
            grid=grid,
            in_specs=[
                pl.BlockSpec((tm, Kp), lambda j, i: (i, 0)),
                pl.BlockSpec((Kp, tn), lambda j, i: (0, j)),
                pl.BlockSpec((1, tn), lambda j, i: (0, j)),
            ],
            out_specs=pl.BlockSpec((tm, tn), lambda j, i: (i, j)),
        ),
        compiler_params=pltpu.CompilerParams(
            dimension_semantics=("parallel", "parallel"),
            vmem_limit_bytes=_vmem_limit(bytes_needed)),
        cost_estimate=pl.CostEstimate(
            flops=2 * M * N * Kp,
            transcendentals=M * N,
            bytes_accessed=2 * (M * Kp + Kp * N + M * N) + 4 * N),
    )(g_in, w, b)


# --------------------------------------------------------------------------
# D: tiled matmul (K last, f32 VMEM accumulator) + fused ReLU + projection
# head folded into a single XLU row-reduce: sum(h * (embed_D(y) + w_out)).
# Output is a lane-dense (tm, 128) slab; every column holds the logit.
# --------------------------------------------------------------------------
def _d_kernel(x_ref, w1_ref, b1_ref, e_ref, o_ref, acc_ref):
    k = pl.program_id(1)

    @pl.when(k == 0)
    def _():
        acc_ref[...] = jnp.zeros_like(acc_ref)

    acc_ref[...] += jnp.dot(x_ref[...], w1_ref[...],
                            preferred_element_type=jnp.float32)

    @pl.when(k == pl.num_programs(1) - 1)
    def _():
        # f32 epilogue on the resident accumulator: VPU relu + XLU row-reduce.
        h = jnp.maximum(acc_ref[...] + b1_ref[...], 0.0)            # ReLU(h)
        logit = jnp.sum(h * e_ref[...], axis=-1, keepdims=True)     # (tm, 1)
        o_ref[...] = jnp.broadcast_to(logit, o_ref.shape).astype(o_ref.dtype)


def d_linear_proj(x_flat, e_eff, w1, b1):
    M, K = x_flat.shape
    Hd = w1.shape[1]
    tm = _pick_tile_m(M)
    tk = _pick_tile(K, TK_PREF)
    grid = (M // tm, K // tk)
    bytes_needed = (2 * (tm * tk * 2 + tk * Hd * 2 + Hd * 4
                         + tm * Hd * 4 + tm * LANE * 4)
                    + tm * Hd * 4)
    out = pl.pallas_call(
        _d_kernel,
        out_shape=jax.ShapeDtypeStruct((M, LANE), jnp.float32),
        grid_spec=pltpu.PrefetchScalarGridSpec(
            num_scalar_prefetch=0,
            grid=grid,
            in_specs=[
                pl.BlockSpec((tm, tk), lambda i, k: (i, k)),
                pl.BlockSpec((tk, Hd), lambda i, k: (k, 0)),
                pl.BlockSpec((1, Hd), lambda i, k: (0, 0)),
                pl.BlockSpec((tm, Hd), lambda i, k: (i, 0)),
            ],
            out_specs=pl.BlockSpec((tm, LANE), lambda i, k: (i, 0)),
            scratch_shapes=[pltpu.VMEM((tm, Hd), jnp.float32)],
        ),
        compiler_params=pltpu.CompilerParams(
            dimension_semantics=("parallel", "arbitrary"),
            vmem_limit_bytes=_vmem_limit(bytes_needed)),
        cost_estimate=pl.CostEstimate(
            flops=2 * M * Hd * K + 4 * M * Hd,
            transcendentals=0,
            bytes_accessed=2 * (M * K + K * Hd) + 4 * (Hd + M * Hd + M * LANE)),
    )(x_flat, w1, b1, e_eff)
    return out[:, :1]  # (M, 1) logits (rest of the slab is broadcast padding).


# --------------------------------------------------------------------------
# Wrappers: G, D, and the G_D.forward glue.
# --------------------------------------------------------------------------
def g_forward_flat(z, gy, params):
    e_g = jnp.take(params["g_shared"], gy, axis=0)          # G.shared(gy)
    g_in = jnp.concatenate([z, e_g], axis=-1)                # [z | e], a few KB
    kp = params["g_w_pad"].shape[0]
    g_in = jnp.pad(g_in, ((0, 0), (0, kp - g_in.shape[1]))).astype(jnp.bfloat16)
    return g_linear(g_in, params["g_w_pad"], params["g_b"])  # (B, n_pix) bf16


def d_forward(x_flat_bf16, y, params):
    # Fold w_out into the embedding row so the kernel epilogue is one reduce:
    #   h @ w_out + sum(embed*h) == sum(h * (embed + w_out_col)).
    e_rows = jnp.take(params["d_embed"], y, axis=0)          # tiny XLA gather
    e_eff = e_rows + params["d_wout"][:, 0][None, :]
    logits = d_linear_proj(x_flat_bf16, e_eff.astype(jnp.float32),
                           params["d_w1_bf16"], params["d_b1"])
    return logits + params["d_bout"]                         # + b_out (scalar)


def g_d_forward(params, z, gy, x=None, dy=None, return_G_z=False, split_D=False):
    """G_D.forward (train_G=False)."""
    # TODO(synk): torch.set_grad_enabled(train_G) has no forward-pass equivalent.
    cfg = params["cfg"]
    C, S = cfg["channels"], cfg["img_hw"]
    B_fake = z.shape[0]
    g_flat = g_forward_flat(z, gy, params)                   # (B_fake, C*H*W) bf16
    # fp16 cross-cast branch of the original is a no-op: single-dtype stand-ins.
    if x is not None and not split_D:
        # Default torch path: one D pass on the stacked fake+real batch, split after.
        x_flat = x.reshape(x.shape[0], -1).astype(jnp.bfloat16)
        d_in = jnp.concatenate([g_flat, x_flat], axis=0)
        d_cls = jnp.concatenate([gy, dy], axis=0)
        d_out = d_forward(d_in, d_cls, params)
        return d_out[:B_fake], d_out[B_fake:]
    # split_D path / no-real-batch paths (D is per-sample => identical numerics).
    d_fake = d_forward(g_flat, gy, params)
    if x is not None:
        x_flat = x.reshape(x.shape[0], -1).astype(jnp.bfloat16)
        return d_fake, d_forward(x_flat, dy, params)
    if return_G_z:
        return d_fake, g_flat.reshape(B_fake, C, S, S).astype(jnp.float32)
    return d_fake


def init_params(key, *, n_classes, z_dim, shared_dim, channels, img_hw, d_hidden):
    n_pix = channels * img_hw * img_hw
    ks = jax.random.split(key, 9)
    sc = 0.05
    g_shared = sc * jax.random.normal(ks[0], (n_classes, shared_dim), jnp.float32)
    g_wz = sc * jax.random.normal(ks[1], (z_dim, n_pix), jnp.float32)
    g_we = sc * jax.random.normal(ks[2], (shared_dim, n_pix), jnp.float32)
    g_b = sc * jax.random.normal(ks[3], (1, n_pix), jnp.float32)
    d_w1 = sc * jax.random.normal(ks[4], (n_pix, d_hidden), jnp.float32)
    d_b1 = sc * jax.random.normal(ks[5], (1, d_hidden), jnp.float32)
    d_embed = sc * jax.random.normal(ks[6], (n_classes, d_hidden), jnp.float32)
    d_wout = sc * jax.random.normal(ks[7], (d_hidden, 1), jnp.float32)
    d_bout = sc * jax.random.normal(ks[8], (1, 1), jnp.float32)
    # Kernel-ready MXU operands: [Wz; We] concatenated once, K zero-padded to a
    # lane-dense multiple of 128, stored in bf16 (f32 accumulation in-kernel).
    k_in = z_dim + shared_dim
    kp = ((k_in + LANE - 1) // LANE) * LANE
    g_w_cat = jnp.concatenate([g_wz, g_we], axis=0)
    g_w_pad = (jnp.zeros((kp, n_pix), jnp.float32).at[:k_in].set(g_w_cat)
               .astype(jnp.bfloat16))
    return {
        "cfg": {"channels": channels, "img_hw": img_hw},
        # f32 master copies (used by the pure-JAX reference path)
        "g_shared": g_shared, "g_wz": g_wz, "g_we": g_we, "g_b": g_b,
        "d_w1": d_w1, "d_b1": d_b1, "d_embed": d_embed,
        "d_wout": d_wout, "d_bout": d_bout,
        # kernel-ready operands
        "g_w_pad": g_w_pad,
        "d_w1_bf16": d_w1.astype(jnp.bfloat16),
    }


# Pure-JAX f32 reference of the original torch graph (explicit concat path).
def g_d_forward_ref(params, z, gy, x, dy):
    cfg = params["cfg"]
    C, S = cfg["channels"], cfg["img_hw"]
    e_g = jnp.take(params["g_shared"], gy, axis=0)
    g_in = jnp.concatenate([z, e_g], axis=-1)
    w = jnp.concatenate([params["g_wz"], params["g_we"]], axis=0)
    g_flat = jnp.tanh(g_in @ w + params["g_b"])
    G_z = g_flat.reshape(z.shape[0], C, S, S)
    D_input = jnp.concatenate([G_z, x], axis=0)
    D_class = jnp.concatenate([gy, dy], axis=0)
    flat = D_input.reshape(D_input.shape[0], -1)
    h = jnp.maximum(flat @ params["d_w1"] + params["d_b1"], 0.0)
    e = jnp.take(params["d_embed"], D_class, axis=0)
    out = h @ params["d_wout"] + params["d_bout"] + jnp.sum(e * h, axis=-1, keepdims=True)
    return out[:z.shape[0]], out[z.shape[0]:]


if __name__ == "__main__":
    B_fake, B_real = 8, 8
    channels, img_hw = 4, 16          # C*H*W = 1024 (multiple of 128)
    z_dim, shared_dim = 32, 32
    d_hidden, n_classes = 256, 10

    key = jax.random.PRNGKey(0)
    kp, kz, kgy, kx, kdy = jax.random.split(key, 5)
    params = init_params(kp, n_classes=n_classes, z_dim=z_dim,
                         shared_dim=shared_dim, channels=channels,
                         img_hw=img_hw, d_hidden=d_hidden)

    z = jax.random.normal(kz, (B_fake, z_dim), jnp.float32)
    gy = jax.random.randint(kgy, (B_fake,), 0, n_classes)
    x = jax.random.normal(kx, (B_real, channels, img_hw, img_hw), jnp.float32)
    dy = jax.random.randint(kdy, (B_real,), 0, n_classes)

    fwd = jax.jit(functools.partial(g_d_forward, params))
    d_fake, d_real = fwd(z, gy, x, dy)
    jax.block_until_ready((d_fake, d_real))

    ref_fake, ref_real = g_d_forward_ref(params, z, gy, x, dy)
    err = max(float(jnp.max(jnp.abs(d_fake - ref_fake))),
              float(jnp.max(jnp.abs(d_real - ref_real))))
    scale = float(jnp.max(jnp.abs(jnp.concatenate([ref_fake, ref_real], 0)))) + 1.0
    # bf16 MXU operands vs. the f32 reference: relative tolerance of 5e-2.
    assert err / scale < 5e-2, f"Pallas vs reference mismatch: {err} (scale {scale})"
    print("KERNEL_OK")
</pallas_src>

<mosaic_0001>
module attributes {stable_mosaic.version = 11 : i64} {
  func.func @_g_linear_kernel(%arg0: i32, %arg1: i32, %arg2: memref<8x128xbf16, #tpu.memory_space<vmem>>, %arg3: memref<128x512xbf16, #tpu.memory_space<vmem>>, %arg4: memref<1x512xf32, #tpu.memory_space<vmem>>, %arg5: memref<8x512xbf16, #tpu.memory_space<vmem>>) attributes {dimension_semantics = [#tpu.dimension_semantics<parallel>, #tpu.dimension_semantics<parallel>], iteration_bounds = array<i64: 2, 1>, scalar_prefetch = 0 : i64, scratch_operands = 0 : i64, tpu.core_type = #tpu.core_type<tc>, window_params = [{transform_indices = @transform_0, window_bounds = array<i64: 8, 128>}, {transform_indices = @transform_1, window_bounds = array<i64: 128, 512>}, {transform_indices = @transform_2, window_bounds = array<i64: 1, 512>}, {transform_indices = @transform_3, window_bounds = array<i64: 8, 512>}]} {
    %c0 = arith.constant 0 : index
    %c0_0 = arith.constant 0 : index
    %0 = vector.load %arg2[%c0, %c0_0] : memref<8x128xbf16, #tpu.memory_space<vmem>>, vector<8x128xbf16>
    %c0_1 = arith.constant 0 : index
    %c0_2 = arith.constant 0 : index
    %1 = vector.load %arg3[%c0_1, %c0_2] : memref<128x512xbf16, #tpu.memory_space<vmem>>, vector<128x512xbf16>
    %cst = arith.constant dense<0.000000e+00> : vector<8x512xf32>
    %2 = tpu.matmul %0, %1, %cst {dimension_numbers = #tpu.dot_dimension_numbers<[1], [0], [0], [1], [0, 0, 1, 1], [], []>} : vector<8x128xbf16>, vector<128x512xbf16>, vector<8x512xf32> -> vector<8x512xf32>
    %c0_3 = arith.constant 0 : index
    %c0_4 = arith.constant 0 : index
    %3 = vector.load %arg4[%c0_3, %c0_4] : memref<1x512xf32, #tpu.memory_space<vmem>>, vector<1x512xf32>
    %4 = vector.broadcast %3 : vector<1x512xf32> to vector<8x512xf32>
    %5 = arith.addf %2, %4 : vector<8x512xf32>
    %6 = math.tanh %5 : vector<8x512xf32>
    %7 = arith.truncf %6 : vector<8x512xf32> to vector<8x512xbf16>
    %c0_5 = arith.constant 0 : index
    %c0_6 = arith.constant 0 : index
    %8 = vector.load %arg5[%c0_5, %c0_6] : memref<8x512xbf16, #tpu.memory_space<vmem>>, vector<8x512xbf16>
    tpu.vector_store %arg5[%c0_5, %c0_6], %7 {strides = array<i32>} : memref<8x512xbf16, #tpu.memory_space<vmem>>, vector<8x512xbf16>,
    return
  }
  func.func @transform_0(%arg0: i32, %arg1: i32) -> (i32, i32) {
    %c0_i32 = arith.constant 0 : i32
    %c0_i32_0 = arith.constant 0 : i32
    return %arg1, %c0_i32 : i32, i32
  }
  func.func @transform_1(%arg0: i32, %arg1: i32) -> (i32, i32) {
    %c0_i32 = arith.constant 0 : i32
    %c0_i32_0 = arith.constant 0 : i32
    return %c0_i32, %arg0 : i32, i32
  }
  func.func @transform_2(%arg0: i32, %arg1: i32) -> (i32, i32) {
    %c0_i32 = arith.constant 0 : i32
    %c0_i32_0 = arith.constant 0 : i32
    return %c0_i32, %arg0 : i32, i32
  }
  func.func @transform_3(%arg0: i32, %arg1: i32) -> (i32, i32) {
    %c0_i32 = arith.constant 0 : i32
    return %arg1, %arg0 : i32, i32
  }
}

module attributes {stable_mosaic.version = 11 : i64} {
  func.func @_d_kernel(%arg0: i32, %arg1: i32, %arg2: memref<8x512xbf16, #tpu.memory_space<vmem>>, %arg3: memref<512x256xbf16, #tpu.memory_space<vmem>>, %arg4: memref<1x256xf32, #tpu.memory_space<vmem>>, %arg5: memref<8x256xf32, #tpu.memory_space<vmem>>, %arg6: memref<8x128xf32, #tpu.memory_space<vmem>>, %arg7: memref<8x256xf32, #tpu.memory_space<vmem>>) attributes {dimension_semantics = [#tpu.dimension_semantics<parallel>, #tpu.dimension_semantics<arbitrary>], iteration_bounds = array<i64: 2, 2>, scalar_prefetch = 0 : i64, scratch_operands = 1 : i64, tpu.core_type = #tpu.core_type<tc>, window_params = [{transform_indices = @transform_0, window_bounds = array<i64: 8, 512>}, {transform_indices = @transform_1, window_bounds = array<i64: 512, 256>}, {pipeline_mode = #tpu.pipeline_mode<synchronous>, transform_indices = @transform_2, window_bounds = array<i64: 1, 256>}, {transform_indices = @transform_3, window_bounds = array<i64: 8, 256>}, {transform_indices = @transform_4, window_bounds = array<i64: 8, 128>}]} {
    %c0_i32 = arith.constant 0 : i32
    %0 = arith.cmpi eq, %arg1, %c0_i32 : i32
    %1 = arith.extui %0 : i1 to i32
    %c0_i32_0 = arith.constant 0 : i32
    %2 = arith.cmpi ne, %1, %c0_i32_0 : i32
    scf.if %2 {
      %cst_9 = arith.constant 0.000000e+00 : f32
      %12 = vector.broadcast %cst_9 : f32 to vector<8x256xf32>
      %c0_10 = arith.constant 0 : index
      %c0_11 = arith.constant 0 : index
      %13 = vector.load %arg7[%c0_10, %c0_11] : memref<8x256xf32, #tpu.memory_space<vmem>>, vector<8x256xf32>
      tpu.vector_store %arg7[%c0_10, %c0_11], %12 {strides = array<i32>} : memref<8x256xf32, #tpu.memory_space<vmem>>, vector<8x256xf32>,
    } else {
    }
    %c0 = arith.constant 0 : index
    %c0_1 = arith.constant 0 : index
    %3 = vector.load %arg7[%c0, %c0_1] : memref<8x256xf32, #tpu.memory_space<vmem>>, vector<8x256xf32>
    %c0_2 = arith.constant 0 : index
    %c0_3 = arith.constant 0 : index
    %4 = vector.load %arg2[%c0_2, %c0_3] : memref<8x512xbf16, #tpu.memory_space<vmem>>, vector<8x512xbf16>
    %c0_4 = arith.constant 0 : index
    %c0_5 = arith.constant 0 : index
    %5 = vector.load %arg3[%c0_4, %c0_5] : memref<512x256xbf16, #tpu.memory_space<vmem>>, vector<512x256xbf16>
    %cst = arith.constant dense<0.000000e+00> : vector<8x256xf32>
    %6 = tpu.matmul %4, %5, %cst {dimension_numbers = #tpu.dot_dimension_numbers<[1], [0], [0], [1], [0, 0, 1, 1], [], []>} : vector<8x512xbf16>, vector<512x256xbf16>, vector<8x256xf32> -> vector<8x256xf32>
    %7 = arith.addf %3, %6 : vector<8x256xf32>
    %c0_6 = arith.constant 0 : index
    %c0_7 = arith.constant 0 : index
    %8 = vector.load %arg7[%c0_6, %c0_7] : memref<8x256xf32, #tpu.memory_space<vmem>>, vector<8x256xf32>
    tpu.vector_store %arg7[%c0_6, %c0_7], %7 {strides = array<i32>} : memref<8x256xf32, #tpu.memory_space<vmem>>, vector<8x256xf32>,
    %c1_i32 = arith.constant 1 : i32
    %9 = arith.cmpi eq, %arg1, %c1_i32 : i32
    %10 = arith.extui %9 : i1 to i32
    %c0_i32_8 = arith.constant 0 : i32
    %11 = arith.cmpi ne, %10, %c0_i32_8 : i32
    scf.if %11 {
      %c0_9 = arith.constant 0 : index
      %c0_10 = arith.constant 0 : index
      %12 = vector.load %arg7[%c0_9, %c0_10] : memref<8x256xf32, #tpu.memory_space<vmem>>, vector<8x256xf32>
      %c0_11 = arith.constant 0 : index
      %c0_12 = arith.constant 0 : index
      %13 = vector.load %arg4[%c0_11, %c0_12] : memref<1x256xf32, #tpu.memory_space<vmem>>, vector<1x256xf32>
      %14 = vector.broadcast %13 : vector<1x256xf32> to vector<8x256xf32>
      %15 = arith.addf %12, %14 : vector<8x256xf32>
      %cst_13 = arith.constant 0.000000e+00 : f32
      %16 = vector.broadcast %cst_13 : f32 to vector<8x256xf32>
      %17 = arith.maximumf %15, %16 : vector<8x256xf32>
      %c0_14 = arith.constant 0 : index
      %c0_15 = arith.constant 0 : index
      %18 = vector.load %arg5[%c0_14, %c0_15] : memref<8x256xf32, #tpu.memory_space<vmem>>, vector<8x256xf32>
      %19 = arith.mulf %17, %18 : vector<8x256xf32>
      %cst_16 = arith.constant dense<0.000000e+00> : vector<8xf32>
      %20 = vector.multi_reduction <add>, %19, %cst_16 [1] : vector<8x256xf32> to vector<8xf32>
      %21 = vector.shape_cast %20 : vector<8xf32> to vector<8x1xf32>
      %22 = vector.shape_cast %21 : vector<8x1xf32> to vector<8x1xf32>
      %23 = vector.broadcast %22 : vector<8x1xf32> to vector<8x128xf32>
      %c0_17 = arith.constant 0 : index
      %c0_18 = arith.constant 0 : index
      %24 = vector.load %arg6[%c0_17, %c0_18] : memref<8x128xf32, #tpu.memory_space<vmem>>, vector<8x128xf32>
      tpu.vector_store %arg6[%c0_17, %c0_18], %23 {strides = array<i32>} : memref<8x128xf32, #tpu.memory_space<vmem>>, vector<8x128xf32>,
    } else {
    }
    return
  }
  func.func @transform_0(%arg0: i32, %arg1: i32) -> (i32, i32) {
    %c0_i32 = arith.constant 0 : i32
    return %arg0, %arg1 : i32, i32
  }
  func.func @transform_1(%arg0: i32, %arg1: i32) -> (i32, i32) {
    %c0_i32 = arith.constant 0 : i32
    %c0_i32_0 = arith.constant 0 : i32
    return %arg1, %c0_i32 : i32, i32
  }
  func.func @transform_2(%arg0: i32, %arg1: i32) -> (i32, i32) {
    %c0_i32 = arith.constant 0 : i32
    %c0_i32_0 = arith.constant 0 : i32
    %c0_i32_1 = arith.constant 0 : i32
    return %c0_i32, %c0_i32_0 : i32, i32
  }
  func.func @transform_3(%arg0: i32, %arg1: i32) -> (i32, i32) {
    %c0_i32 = arith.constant 0 : i32
    %c0_i32_0 = arith.constant 0 : i32
    return %arg0, %c0_i32 : i32, i32
  }
  func.func @transform_4(%arg0: i32, %arg1: i32) -> (i32, i32) {
    %c0_i32 = arith.constant 0 : i32
    %c0_i32_0 = arith.constant 0 : i32
    return %arg0, %c0_i32 : i32, i32
  }
}

</mosaic_0001>

<bundles_post_ra>
// kernel: g_d_forward.2
= control target key start
LH: loop header
LB: loop body
LE: loop exit
PB: predicated region body
PF: predicated region fallthrough
CT: control target
= control target key end

     0   :  { %s954_s12 = smov 0   ;;  %s956_s13 = smov 0   ;;  %s1131_s0 = inlined_call_operand.vmem [shape: bf16[8,128], index: 0, kind: input, shape index: {}]   ;;  %s1132_s1 = inlined_call_operand.vmem [shape: bf16[128,1024], index: 1, kind: input, shape index: {}]   ;;  %s1133_s2 = inlined_call_operand.vmem [shape: f32[1,1024], index: 2, kind: input, shape index: {}]   ;;  %s1134_s3 = inlined_call_operand.vmem [shape: bf16[8,1024], index: 3, kind: output, shape index: {}]  }
   0x1   :  { %s958_s14 = smov 0   ;;  %s960_s15 = smov 0  }
   0x2   :  { %s962_s16 = smov 0  }
   0x3 LB: > { %s25_s17 = sadd.s32 1, %s927_s15  ;;  %p65_p1 = scmp.ne.s32.totalorder %s919_s13, %s915_s12  ;;  %s931_s16 = sphi %s962_s16, %s13_s16   ;;  %s927_s15 = sphi %s960_s15, %s1138_s15   ;;  %s923_s14 = sphi %s958_s14, %s1137_s14   ;;  %s919_s13 = sphi %s956_s13, %s1136_s13   ;;  %s915_s12 = sphi %s954_s12, %s1135_s12  }
   0x4   : > { %p27_p0 = scmp.ge.s32.totalorder %s25_s17, 2  ;;  %p66_p2 = scmp.eq.s32.totalorder %s931_s16, 0 }
   0x5   : > { %s58_s19 = sadd.s32 1, %s919_s13  ;;  %p748_p5 = scmp.ge.s32.totalorder %s931_s16, 2 }
   0x6   : > { %s1140_s17 = smov (%p27_p0, %s25_s17), 0  ;;  %p67_p3 = por %p66_p2, %p65_p1 }
   0x7   : > { %s55_s18 = ssub.s32 %s927_s15, %s1140_s17  ;;  %152 = sbr.rel (%p748_p5) target bundleno = 32 (0x20), region = 20 }
   0x8   : > { %p56_p4 = scmp.eq.s32.totalorder %s55_s18, 0 }
   0xa   : > { %s989_s20 = scalar_select %p56_p4, %s919_s13, %s58_s19  }
   0xc   : > { %155 = sbr.rel (!%p67_p3) target bundleno = 32 (0x20), region = 24  ;;  %s157_s21 = sand.u32 (%p67_p3), 1, %s919_s13  }
   0xd   : > { %s793_s22 = sshll.u32 (%p67_p3), %s927_s15, 4  ;;  %s749_s23 = sshll.u32 (%p67_p3), %s157_s21, 8 }
   0xe   : > { %s997_s26 = scalar_lea.vmem (%p67_p3), %s1132_s1, %s793_s22  ;;  %s1002_s27 = scalar_lea.vmem (%p67_p3), [#allocation2], %s749_s23 }
   0xf   : > { %v175_v0 = vld [vmem:[%s997_s26] sm:$0xff] (%p67_p3)  ;;  %v177_v1 = vld [vmem:[%s997_s26 + $0x8] sm:$0xff] (%p67_p3) }
  0x10   : > { %v179_v2 = vld [vmem:[%s997_s26 + $0x20] sm:$0xff] (%p67_p3)  ;;  %176 = vst [vmem:[%s1002_s27] sm:$0xff] (%p67_p3), %v175_v0  ;;  %178 = vst [vmem:[%s1002_s27 + $0x8] sm:$0xff] (%p67_p3), %v177_v1  ;;  %v181_v3 = vld [vmem:[%s997_s26 + $0x28] sm:$0xff] (%p67_p3) }
  0x11   : > { %180 = vst [vmem:[%s1002_s27 + $0x10] sm:$0xff] %v179_v2  ;;  %v183_v4 = vld [vmem:[%s997_s26 + $0x40] sm:$0xff]  ;;  %v185_v5 = vld [vmem:[%s997_s26 + $0x48] sm:$0xff]  ;;  %182 = vst [vmem:[%s1002_s27 + $0x18] sm:$0xff] %v181_v3 }
  0x12   : > { %184 = vst [vmem:[%s1002_s27 + $0x20] sm:$0xff] %v183_v4  ;;  %186 = vst [vmem:[%s1002_s27 + $0x28] sm:$0xff] %v185_v5  ;;  %v187_v6 = vld [vmem:[%s997_s26 + $0x60] sm:$0xff]  ;;  %v189_v7 = vld [vmem:[%s997_s26 + $0x68] sm:$0xff] }
  0x13   : > { %v191_v8 = vld [vmem:[%s997_s26 + $0x80] sm:$0xff]  ;;  %188 = vst [vmem:[%s1002_s27 + $0x30] sm:$0xff] %v187_v6  ;;  %190 = vst [vmem:[%s1002_s27 + $0x38] sm:$0xff] %v189_v7  ;;  %v193_v9 = vld [vmem:[%s997_s26 + $0x88] sm:$0xff] }
  0x14   : > { %192 = vst [vmem:[%s1002_s27 + $0x40] sm:$0xff] %v191_v8  ;;  %v195_v10 = vld [vmem:[%s997_s26 + $0xa0] sm:$0xff]  ;;  %v197_v11 = vld [vmem:[%s997_s26 + $0xa8] sm:$0xff]  ;;  %194 = vst [vmem:[%s1002_s27 + $0x48] sm:$0xff] %v193_v9 }
  0x15   : > { %196 = vst [vmem:[%s1002_s27 + $0x50] sm:$0xff] %v195_v10  ;;  %198 = vst [vmem:[%s1002_s27 + $0x58] sm:$0xff] %v197_v11  ;;  %v199_v12 = vld [vmem:[%s997_s26 + $0xc0] sm:$0xff]  ;;  %v201_v13 = vld [vmem:[%s997_s26 + $0xc8] sm:$0xff] }
  0x16   : > { %v203_v14 = vld [vmem:[%s997_s26 + $0xe0] sm:$0xff]  ;;  %200 = vst [vmem:[%s1002_s27 + $0x60] sm:$0xff] %v199_v12  ;;  %202 = vst [vmem:[%s1002_s27 + $0x68] sm:$0xff] %v201_v13  ;;  %v205_v15 = vld [vmem:[%s997_s26 + $0xe8] sm:$0xff] }
  0x17   : > { %204 = vst [vmem:[%s1002_s27 + $0x70] sm:$0xff] %v203_v14  ;;  %v207_v16 = vld [vmem:[%s997_s26 + $0x100] sm:$0xff]  ;;  %v209_v17 = vld [vmem:[%s997_s26 + $0x108] sm:$0xff]  ;;  %206 = vst [vmem:[%s1002_s27 + $0x78] sm:$0xff] %v205_v15 }
  0x18   : > { %208 = vst [vmem:[%s1002_s27 + $0x80] sm:$0xff] %v207_v16  ;;  %210 = vst [vmem:[%s1002_s27 + $0x88] sm:$0xff] %v209_v17  ;;  %v211_v18 = vld [vmem:[%s997_s26 + $0x120] sm:$0xff]  ;;  %v213_v19 = vld [vmem:[%s997_s26 + $0x128] sm:$0xff] }
  0x19   : > { %v215_v20 = vld [vmem:[%s997_s26 + $0x140] sm:$0xff]  ;;  %212 = vst [vmem:[%s1002_s27 + $0x90] sm:$0xff] %v211_v18  ;;  %214 = vst [vmem:[%s1002_s27 + $0x98] sm:$0xff] %v213_v19  ;;  %v217_v21 = vld [vmem:[%s997_s26 + $0x148] sm:$0xff] }
  0x1a   : > { %216 = vst [vmem:[%s1002_s27 + $0xa0] sm:$0xff] %v215_v20  ;;  %v219_v22 = vld [vmem:[%s997_s26 + $0x160] sm:$0xff]  ;;  %v221_v23 = vld [vmem:[%s997_s26 + $0x168] sm:$0xff]  ;;  %218 = vst [vmem:[%s1002_s27 + $0xa8] sm:$0xff] %v217_v21 }
  0x1b   : > { %220 = vst [vmem:[%s1002_s27 + $0xb0] sm:$0xff] %v219_v22  ;;  %222 = vst [vmem:[%s1002_s27 + $0xb8] sm:$0xff] %v221_v23  ;;  %v223_v24 = vld [vmem:[%s997_s26 + $0x180] sm:$0xff]  ;;  %v225_v25 = vld [vmem:[%s997_s26 + $0x188] sm:$0xff] }
  0x1c   : > { %v227_v26 = vld [vmem:[%s997_s26 + $0x1a0] sm:$0xff]  ;;  %224 = vst [vmem:[%s1002_s27 + $0xc0] sm:$0xff] %v223_v24  ;;  %226 = vst [vmem:[%s1002_s27 + $0xc8] sm:$0xff] %v225_v25  ;;  %v229_v27 = vld [vmem:[%s997_s26 + $0x1a8] sm:$0xff] }
  0x1d   : > { %228 = vst [vmem:[%s1002_s27 + $0xd0] sm:$0xff] %v227_v26  ;;  %v231_v28 = vld [vmem:[%s997_s26 + $0x1c0] sm:$0xff]  ;;  %v233_v29 = vld [vmem:[%s997_s26 + $0x1c8] sm:$0xff]  ;;  %230 = vst [vmem:[%s1002_s27 + $0xd8] sm:$0xff] %v229_v27 }
  0x1e   : > { %232 = vst [vmem:[%s1002_s27 + $0xe0] sm:$0xff] %v231_v28  ;;  %234 = vst [vmem:[%s1002_s27 + $0xe8] sm:$0xff] %v233_v29  ;;  %v235_v30 = vld [vmem:[%s997_s26 + $0x1e0] sm:$0xff]  ;;  %v237_v31 = vld [vmem:[%s997_s26 + $0x1e8] sm:$0xff] }
  0x1f   : > { %236 = vst [vmem:[%s1002_s27 + $0xf0] sm:$0xff] %v235_v30  ;;  %238 = vst [vmem:[%s1002_s27 + $0xf8] sm:$0xff] %v237_v31 }
  0x20 PF: > { %p752_p6 = scmp.ge.s32.totalorder %s931_s16, 1  ;;  %p251_p7 = scmp.lt.s32.totalorder %s931_s16, 3 }
  0x22   : > { %p252_p8 = pnand %p752_p6, %p251_p7 }
  0x23   : > { %s258_s28 = sand.u32 (!%p252_p8), 1, %s915_s12   ;;  %s754_s6 = sshll.u32 (!%p252_p8), %s923_s14, 2 }
  0x24   : > { %255 = sbr.rel (%p252_p8) target bundleno = 290 (0x122), region = 51  ;;  %s753_s29 = sshll.u32 (!%p252_p8), %s258_s28, 8 }
  0x25   : > { %s1068_s30 = scalar_lea.vmem (!%p252_p8), [#allocation2], %s753_s29  ;;  %p299_p9 = scmp.lt.s32.totalorder (!%p252_p8), %s754_s6, 7 }
  0x29   : > { %v933_v32 = vmov 0   ;;  %v837_v33 = vld [vmem:[%s1068_s30 + $0xe4] ss:$16 sps:$4 sm:$0xff]   ;;  %v839_v34 = vld [vmem:[%s1068_s30 + $0xec] ss:$16 sps:$4 sm:$0xff]   ;;  %v349_v2 = vlaneseq  ;;  %s1142_s6 = smov (!%p299_p9, %s754_s6), 7 }
  0x2a   : > { %561 = vmatprep.mubr.bf16.mxu0 %v933_v32  ;;  %602 = vmatprep.mubr.bf16.mxu1 %v933_v32  ;;  %v841_v35 = vld [vmem:[%s1068_s30 + $0xe0] ss:$16 sps:$4 sm:$0xff]   ;;  %v842_v36 = vld [vmem:[%s1068_s30 + $0xe8] ss:$16 sps:$4 sm:$0xff]   ;;  %v843_v37 = vld [vmem:[%s1068_s30 + $0xc4] ss:$16 sps:$4 sm:$0xff]   ;;  %s301_s9 = scalar_lea.vmem %s1133_s2, %s1142_s6 }
  0x2b   : > { %529 = vmatprep.subr.bf16.mxu0 %v837_v33  ;;  %570 = vmatprep.subr.bf16.mxu1 %v839_v34  ;;  %v845_v38 = vld [vmem:[%s1068_s30 + $0xcc] ss:$16 sps:$4 sm:$0xff]   ;;  %v847_v39 = vld [vmem:[%s1068_s30 + $0xc0] ss:$16 sps:$4 sm:$0xff]   ;;  %v848_v40 = vld [vmem:[%s1068_s30 + $0xc8] ss:$16 sps:$4 sm:$0xff]  }
  0x2c   : > { %530 = vmatpush1.bf16.msra.mxu0 %v841_v35  ;;  %571 = vmatpush1.bf16.msra.mxu1 %v842_v36  ;;  %v849_v41 = vld [vmem:[%s1068_s30 + $0xa4] ss:$16 sps:$4 sm:$0xff]   ;;  %v851_v42 = vld [vmem:[%s1068_s30 + $0xac] ss:$16 sps:$4 sm:$0xff]   ;;  %v853_v43 = vld [vmem:[%s1068_s30 + $0xa0] ss:$16 sps:$4 sm:$0xff]  }
  0x2d   : > { %531 = vmatprep.subr.bf16.mxu0 %v843_v37  ;;  %572 = vmatprep.subr.bf16.mxu1 %v845_v38  ;;  %v854_v44 = vld [vmem:[%s1068_s30 + $0xa8] ss:$16 sps:$4 sm:$0xff]   ;;  %v855_v45 = vld [vmem:[%s1068_s30 + $0x84] ss:$16 sps:$4 sm:$0xff]   ;;  %v857_v46 = vld [vmem:[%s1068_s30 + $0x8c] ss:$16 sps:$4 sm:$0xff]  }
  0x2e   : > { %v859_v47 = vld [vmem:[%s1068_s30 + $0x80] ss:$16 sps:$4 sm:$0xff]   ;;  %v860_v48 = vld [vmem:[%s1068_s30 + $0x88] ss:$16 sps:$4 sm:$0xff]   ;;  %v861_v49 = vld [vmem:[%s1068_s30 + $0x64] ss:$16 sps:$4 sm:$0xff]  }
  0x2f   : > { %v863_v50 = vld [vmem:[%s1068_s30 + $0x6c] ss:$16 sps:$4 sm:$0xff]   ;;  %v865_v51 = vld [vmem:[%s1068_s30 + $0x60] ss:$16 sps:$4 sm:$0xff]   ;;  %v866_v52 = vld [vmem:[%s1068_s30 + $0x68] ss:$16 sps:$4 sm:$0xff]  }
  0x30   : > { %532 = vmatpush1.bf16.msra.mxu0 %v847_v39  ;;  %573 = vmatpush1.bf16.msra.mxu1 %v848_v40  ;;  %v867_v53 = vld [vmem:[%s1068_s30 + $0x44] ss:$16 sps:$4 sm:$0xff]   ;;  %v869_v54 = vld [vmem:[%s1068_s30 + $0x4c] ss:$16 sps:$4 sm:$0xff]   ;;  %v871_v55 = vld [vmem:[%s1068_s30 + $0x40] ss:$16 sps:$4 sm:$0xff]  }
  0x31   : > { %533 = vmatprep.subr.bf16.mxu0 %v849_v41  ;;  %574 = vmatprep.subr.bf16.mxu1 %v851_v42  ;;  %v872_v56 = vld [vmem:[%s1068_s30 + $0x48] ss:$16 sps:$4 sm:$0xff]   ;;  %v873_v57 = vld [vmem:[%s1068_s30 + $0x24] ss:$16 sps:$4 sm:$0xff]   ;;  %v875_v58 = vld [vmem:[%s1068_s30 + $0x2c] ss:$16 sps:$4 sm:$0xff]  }
  0x32   : > { %v877_v59 = vld [vmem:[%s1068_s30 + $0x20] ss:$16 sps:$4 sm:$0xff]   ;;  %v878_v60 = vld [vmem:[%s1068_s30 + $0x28] ss:$16 sps:$4 sm:$0xff]   ;;  %v879_v61 = vld [vmem:[%s1068_s30 + $0x4] ss:$16 sps:$4 sm:$0xff]  }
  0x33   : > { %v881_v62 = vld [vmem:[%s1068_s30 + $0xc] ss:$16 sps:$4 sm:$0xff]   ;;  %v883_v63 = vld [vmem:[%s1068_s30] ss:$16 sps:$4 sm:$0xff]   ;;  %v884_v0 = vld [vmem:[%s1068_s30 + $0x8] ss:$16 sps:$4 sm:$0xff]  }
  0x34   : > { %534 = vmatpush1.bf16.msra.mxu0 %v853_v43  ;;  %575 = vmatpush1.bf16.msra.mxu1 %v854_v44  ;;  %v314_v1 = vld [vmem:[%s1131_s0] sm:$0xf]  ;;  %v350_v3 = vshrl.u32 %v349_v2, 7  ;;  %s756_s10 = sshll.u32 %s1142_s6, 2 }
  0x35   : > { %535 = vmatprep.subr.bf16.mxu0 %v855_v45  ;;  %576 = vmatprep.subr.bf16.mxu1 %v857_v46  ;;  %v347_v6 = vld [vmem:[%s301_s9] sm:$0xf]  ;;  %s311_s14 = scalar_lea.vmem %s1134_s3, %s756_s10 }
  0x36   : > { %v351_v4 = vsub.s32 0, %v350_v3  ;;  %v359_v5 = vsub.s32 2, %v350_v3  ;;  %v355_v7 = vsub.s32 1, %v350_v3  ;;  %v363_v8 = vsub.s32 3, %v350_v3 }
  0x38   : > { %536 = vmatpush1.bf16.msra.mxu0 %v859_v47  ;;  %577 = vmatpush1.bf16.msra.mxu1 %v860_v48  ;;  %v352_v9 = vrot.slane %v347_v6, %v351_v4  ;;  %v360_v10 = vrot.slane %v347_v6, %v359_v5  ;;  %v356_v11 = vrot.slane %v347_v6, %v355_v7 }
  0x39   : > { %537 = vmatprep.subr.bf16.mxu0 %v861_v49  ;;  %578 = vmatprep.subr.bf16.mxu1 %v863_v50  ;;  %v364_v12 = vrot.slane %v347_v6, %v363_v8 }
  0x3c   : > { %538 = vmatpush1.bf16.msra.mxu0 %v865_v51  ;;  %579 = vmatpush1.bf16.msra.mxu1 %v866_v52 }
  0x3d   : > { %539 = vmatprep.subr.bf16.mxu0 %v867_v53  ;;  %580 = vmatprep.subr.bf16.mxu1 %v869_v54 }
  0x40   : > { %540 = vmatpush1.bf16.msra.mxu0 %v871_v55  ;;  %581 = vmatpush1.bf16.msra.mxu1 %v872_v56 }
  0x41   : > { %541 = vmatprep.subr.bf16.mxu0 %v873_v57  ;;  %582 = vmatprep.subr.bf16.mxu1 %v875_v58 }
  0x44   : > { %542 = vmatpush1.bf16.msra.mxu0 %v877_v59  ;;  %583 = vmatpush1.bf16.msra.mxu1 %v878_v60 }
  0x45   : > { %543 = vmatprep.subr.bf16.mxu0 %v879_v61  ;;  %584 = vmatprep.subr.bf16.mxu1 %v881_v62 }
  0x48   : > { %544 = vmatpush1.bf16.msra.mxu0 %v883_v63  ;;  %585 = vmatpush1.bf16.msra.mxu1 %v884_v0 }
  0x4b   : > { %562 = vmatmul.mubr.bf16.vlgmr.msra.gmra.mxu0 %v314_v1  ;;  %603 = vmatmul.mubr.bf16.vlgmr.msra.gmra.mxu1 %v314_v1 }
 0x10b   : > { %v563_v13 = vpop.f32.mrf.mxu0  ;;  %v604_v14 = vpop.f32.mrf.mxu1 }
 0x10c   : > { %v564_v15 = vadd.f32 %v563_v13, %v352_v9  ;;  %v605_v16 = vadd.f32 %v604_v14, %v360_v10 }
 0x10d   : > { %v565_v17 = vpop.f32.mrf.mxu0  ;;  %v606_v18 = vpop.f32.mrf.mxu1 }
 0x10e   : > { %885 = vtanh.f32 %v564_v15  ;;  %v566_v19 = vadd.f32 %v565_v17, %v356_v11  ;;  %v607_v20 = vadd.f32 %v606_v18, %v364_v12 }
 0x10f   : > { %887 = vtanh.f32 %v605_v16  ;;  %v567_v21 = vpop.f32.mrf.mxu0  ;;  %v608_v22 = vpop.f32.mrf.mxu1 }
 0x110   : > { %889 = vtanh.f32 %v566_v19 }
 0x111   : > { %891 = vtanh.f32 %v607_v20  ;;  %v568_v23 = vpop.f32.mrf.mxu0  ;;  %v609_v24 = vpop.f32.mrf.mxu1 }
 0x11b   : > { %v886_v25 = vpop.eup %885 }
 0x11c   : > { %v888_v26 = vpop.eup %887 }
 0x11d   : > { %v890_v27 = vpop.eup %889 }
 0x11e   : > { %v892_v28 = vpop.eup %891  ;;  %v794_v29 = vpack.c.bf16 %v890_v27, %v886_v25 }
 0x11f   : > { %v795_v30 = vpack.c.bf16 %v892_v28, %v888_v26 }
 0x120   : > { %631 = vst [vmem:[%s311_s14] sm:$0xff] %v794_v29 }
 0x121   : > { %632 = vst [vmem:[%s311_s14 + $0x8] sm:$0xff] %v795_v30 }
 0x122 PF: > { %s13_s16 = sadd.s32 1, %s931_s16   ;;  %s1135_s12 = smov %s919_s13 }
 0x123   : > { %p10_p10 = scmp.ge.s32.totalorder %s13_s16, 4   ;;  %s1136_s13 = smov %s989_s20 }
 0x124   : > { %s1137_s14 = smov %s927_s15  ;;  %s1138_s15 = smov %s1140_s17 }
 0x125   :  { %12 = sbr.rel (!%p10_p10) target bundleno = 3 (0x3), region = 96 }

// kernel: g_d_forward.3
= control target key start
LH: loop header
LB: loop body
LE: loop exit
PB: predicated region body
PF: predicated region fallthrough
CT: control target
= control target key end

     0   :  { %s1182_s15 = smov 0   ;;  %s1184_s16 = smov 0   ;;  %s1325_s0 = inlined_call_operand.vmem [shape: bf16[16,1024], index: 0, kind: input, shape index: {}]   ;;  %s1326_s1 = inlined_call_operand.vmem [shape: bf16[1024,256], index: 1, kind: input, shape index: {}]   ;;  %s1327_s2 = inlined_call_operand.vmem [shape: f32[1,256], index: 2, kind: input, shape index: {}]   ;;  %s1328_s3 = inlined_call_operand.vmem [shape: f32[16,256], index: 3, kind: input, shape index: {}]   ;;  %s1329_s4 = inlined_call_operand.vmem [shape: f32[16,128], index: 4, kind: output, shape index: {}]  }
   0x1   :  { %s1186_s17 = smov 0   ;;  %s1188_s18 = smov 0  }
   0x2   :  { %s1190_s19 = smov 0  }
   0x3 LB: > { %s23_s20 = sadd.s32 1, %s1146_s17  ;;  %s26_s21 = sadd.s32 1, %s1150_s18  ;;  %s1154_s19 = sphi %s1190_s19, %s14_s19   ;;  %s1150_s18 = sphi %s1188_s18, %s1333_s18   ;;  %s1146_s17 = sphi %s1186_s17, %s1332_s17   ;;  %s1142_s16 = sphi %s1184_s16, %s1331_s16   ;;  %s1138_s15 = sphi %s1182_s15, %s1330_s15  }
   0x4   : > { %p24_p0 = scmp.ge.s32.totalorder %s23_s20, 2  ;;  %p891_p1 = scmp.ge.s32.totalorder %s1154_s19, 1 }
   0x5   : > { %p203_p2 = scmp.lt.s32.totalorder %s1154_s19, 5 }
   0x6   : > { %s1335_s20 = smov (%p24_p0, %s23_s20), 0  ;;  %s1337_s21 = smov (!%p24_p0, %s26_s21), %s1150_s18 }
   0x7   : > { %p204_p3 = pnand %p891_p1, %p203_p2  ;;  %p28_p4 = scmp.ge.s32.totalorder %s1337_s21, 2 }
   0x8   : > { %s892_s22 = sshll.u32 (!%p204_p3), %s1138_s15, 2  ;;  %p244_p5 = scmp.lt.s32.totalorder (!%p204_p3), %s1142_s16, 1 }
   0x9   : > { %s1339_s21 = smov (%p28_p4, %s1337_s21), 0  ;;  %207 = sbr.rel (%p204_p3) target bundleno = 447 (0x1bf), region = 36 }
   0xa   : > { %p246_p6 = scmp.lt.s32.totalorder (!%p204_p3), %s892_s22, 7  ;;  %s895_s23 = sshll.u32 (!%p204_p3), %s1138_s15, 6 }
   0xb   : > { %p254_p7 = scmp.lt.s32.totalorder (!%p204_p3), %s895_s23, 127  ;;  %p901_p8 = scmp.ne.s32.totalorder (!%p204_p3), %s1138_s15, 0 }
   0xe   : > { %s1341_s16 = smov (!%p244_p5, %s1142_s16), 1  ;;  %s1343_s22 = smov (!%p246_p6, %s892_s22), 7 }
   0xf   : > { %s893_s24 = sshll.u32 %s1341_s16, 3  ;;  %s974_s26 = sshll.u32 %s1341_s16, 4 }
  0x10   : > { %s249_s25 = sadd.s32 %s893_s24, %s1343_s22  ;;  %s1219_s30 = scalar_lea.vmem %s1328_s3, %s974_s26 }
  0x11   : > { %s894_s27 = sshll.u32 %s249_s25, 2  ;;  %s1229_s10 = scalar_lea.vmem %s1329_s4, %s893_s24 }
  0x12   : > { %s1224_s7 = scalar_lea.vmem %s1325_s0, %s894_s27  ;;  %s1345_s23 = smov (!%p254_p7, %s895_s23), 127 }
  0x13   : > { %s973_s11 = sshll.u32 %s1345_s23, 3  ;;  %272 = sbr.rel (%p901_p8) target bundleno = 26 (0x1a), region = 40 }
  0x14   : > { %s1234_s14 = scalar_lea.vmem %s1326_s1, %s973_s11 }
  0x18   : > { %v1156_v0 = vmov 0.0  }
  0x19   : > { %273 = vst [vmem:[#allocation2] sm:$0xff] %v1156_v0  ;;  %274 = vst [vmem:[#allocation2 + $0x8] sm:$0xff] %v1156_v0 }
  0x1a PF: > { %v1016_v1 = vld [vmem:[%s1234_s14 + $0x74] ss:$8 sps:$4 sm:$0xff]   ;;  %v1020_v3 = vld [vmem:[%s1234_s14 + $0x70] ss:$8 sps:$4 sm:$0xff]   ;;  %v1022_v5 = vld [vmem:[%s1234_s14 + $0x64] ss:$8 sps:$4 sm:$0xff]  }
  0x1b   : > { %v1018_v2 = vld [vmem:[%s1234_s14 + $0x174] ss:$8 sps:$4 sm:$0xff]   ;;  %677 = vmatprep.subr.bf16.mxu0 %v1016_v1  ;;  %v1021_v4 = vld [vmem:[%s1234_s14 + $0x170] ss:$8 sps:$4 sm:$0xff]   ;;  %v1024_v6 = vld [vmem:[%s1234_s14 + $0x164] ss:$8 sps:$4 sm:$0xff]  }
  0x1c   : > { %718 = vmatprep.subr.bf16.mxu1 %v1018_v2  ;;  %678 = vmatpush1.bf16.msra.mxu0 %v1020_v3  ;;  %v1026_v7 = vld [vmem:[%s1234_s14 + $0x60] ss:$8 sps:$4 sm:$0xff]   ;;  %v1028_v9 = vld [vmem:[%s1234_s14 + $0x54] ss:$8 sps:$4 sm:$0xff]   ;;  %v1032_v11 = vld [vmem:[%s1234_s14 + $0x50] ss:$8 sps:$4 sm:$0xff]  }
  0x1d   : > { %719 = vmatpush1.bf16.msra.mxu1 %v1021_v4  ;;  %679 = vmatprep.subr.bf16.mxu0 %v1022_v5  ;;  %v1027_v8 = vld [vmem:[%s1234_s14 + $0x160] ss:$8 sps:$4 sm:$0xff]   ;;  %v1030_v10 = vld [vmem:[%s1234_s14 + $0x154] ss:$8 sps:$4 sm:$0xff]   ;;  %v1033_v12 = vld [vmem:[%s1234_s14 + $0x150] ss:$8 sps:$4 sm:$0xff]  }
  0x1e   : > { %720 = vmatprep.subr.bf16.mxu1 %v1024_v6  ;;  %v1034_v13 = vld [vmem:[%s1234_s14 + $0x44] ss:$8 sps:$4 sm:$0xff]   ;;  %v1038_v15 = vld [vmem:[%s1234_s14 + $0x40] ss:$8 sps:$4 sm:$0xff]   ;;  %v1040_v17 = vld [vmem:[%s1234_s14 + $0x34] ss:$8 sps:$4 sm:$0xff]  }
  0x1f   : > { %v1036_v14 = vld [vmem:[%s1234_s14 + $0x144] ss:$8 sps:$4 sm:$0xff]   ;;  %v1039_v16 = vld [vmem:[%s1234_s14 + $0x140] ss:$8 sps:$4 sm:$0xff]   ;;  %v1042_v18 = vld [vmem:[%s1234_s14 + $0x134] ss:$8 sps:$4 sm:$0xff]  }
  0x20   : > { %680 = vmatpush1.bf16.msra.mxu0 %v1026_v7  ;;  %v1044_v19 = vld [vmem:[%s1234_s14 + $0x30] ss:$8 sps:$4 sm:$0xff]   ;;  %v1046_v21 = vld [vmem:[%s1234_s14 + $0x24] ss:$8 sps:$4 sm:$0xff]   ;;  %v1050_v23 = vld [vmem:[%s1234_s14 + $0x20] ss:$8 sps:$4 sm:$0xff]  }
  0x21   : > { %721 = vmatpush1.bf16.msra.mxu1 %v1027_v8  ;;  %681 = vmatprep.subr.bf16.mxu0 %v1028_v9  ;;  %v1045_v20 = vld [vmem:[%s1234_s14 + $0x130] ss:$8 sps:$4 sm:$0xff]   ;;  %v1048_v22 = vld [vmem:[%s1234_s14 + $0x124] ss:$8 sps:$4 sm:$0xff]   ;;  %v1051_v24 = vld [vmem:[%s1234_s14 + $0x120] ss:$8 sps:$4 sm:$0xff]  }
  0x22   : > { %722 = vmatprep.subr.bf16.mxu1 %v1030_v10  ;;  %v1052_v25 = vld [vmem:[%s1234_s14 + $0x14] ss:$8 sps:$4 sm:$0xff]   ;;  %v1056_v27 = vld [vmem:[%s1234_s14 + $0x10] ss:$8 sps:$4 sm:$0xff]   ;;  %v1058_v29 = vld [vmem:[%s1234_s14 + $0x4] ss:$8 sps:$4 sm:$0xff]  }
  0x23   : > { %v1054_v26 = vld [vmem:[%s1234_s14 + $0x114] ss:$8 sps:$4 sm:$0xff]   ;;  %v1057_v28 = vld [vmem:[%s1234_s14 + $0x110] ss:$8 sps:$4 sm:$0xff]   ;;  %v1060_v30 = vld [vmem:[%s1234_s14 + $0x104] ss:$8 sps:$4 sm:$0xff]  }
  0x24   : > { %682 = vmatpush1.bf16.msra.mxu0 %v1032_v11  ;;  %v1062_v31 = vld [vmem:[%s1234_s14] ss:$8 sps:$4 sm:$0xff]   ;;  %v1064_v33 = vld [vmem:[%s1234_s14 + $0xf4] ss:$8 sps:$4 sm:$0xff]   ;;  %v1068_v35 = vld [vmem:[%s1234_s14 + $0xf0] ss:$8 sps:$4 sm:$0xff]  }
  0x25   : > { %723 = vmatpush1.bf16.msra.mxu1 %v1033_v12  ;;  %683 = vmatprep.subr.bf16.mxu0 %v1034_v13  ;;  %v1063_v32 = vld [vmem:[%s1234_s14 + $0x100] ss:$8 sps:$4 sm:$0xff]   ;;  %v1066_v34 = vld [vmem:[%s1234_s14 + $0x1f4] ss:$8 sps:$4 sm:$0xff]   ;;  %v1069_v36 = vld [vmem:[%s1234_s14 + $0x1f0] ss:$8 sps:$4 sm:$0xff]  }
  0x26   : > { %724 = vmatprep.subr.bf16.mxu1 %v1036_v14  ;;  %v1070_v37 = vld [vmem:[%s1234_s14 + $0xe4] ss:$8 sps:$4 sm:$0xff]   ;;  %v1074_v39 = vld [vmem:[%s1234_s14 + $0xe0] ss:$8 sps:$4 sm:$0xff]   ;;  %v1076_v41 = vld [vmem:[%s1234_s14 + $0xd4] ss:$8 sps:$4 sm:$0xff]  }
  0x27   : > { %v1072_v38 = vld [vmem:[%s1234_s14 + $0x1e4] ss:$8 sps:$4 sm:$0xff]   ;;  %v1075_v40 = vld [vmem:[%s1234_s14 + $0x1e0] ss:$8 sps:$4 sm:$0xff]   ;;  %v1078_v42 = vld [vmem:[%s1234_s14 + $0x1d4] ss:$8 sps:$4 sm:$0xff]  }
  0x28   : > { %684 = vmatpush1.bf16.msra.mxu0 %v1038_v15  ;;  %v1080_v43 = vld [vmem:[%s1234_s14 + $0xd0] ss:$8 sps:$4 sm:$0xff]   ;;  %v1082_v45 = vld [vmem:[%s1234_s14 + $0xc4] ss:$8 sps:$4 sm:$0xff]   ;;  %v1086_v50 = vld [vmem:[%s1234_s14 + $0xc0] ss:$8 sps:$4 sm:$0xff]  }
  0x29   : > { %725 = vmatpush1.bf16.msra.mxu1 %v1039_v16  ;;  %685 = vmatprep.subr.bf16.mxu0 %v1040_v17  ;;  %v1081_v44 = vld [vmem:[%s1234_s14 + $0x1d0] ss:$8 sps:$4 sm:$0xff]   ;;  %v1084_v46 = vld [vmem:[%s1234_s14 + $0x1c4] ss:$8 sps:$4 sm:$0xff]   ;;  %v1087_v51 = vld [vmem:[%s1234_s14 + $0x1c0] ss:$8 sps:$4 sm:$0xff]  }
  0x2a   : > { %726 = vmatprep.subr.bf16.mxu1 %v1042_v18  ;;  %v277_v47 = vld [vmem:[%s1224_s7] sm:$0xff]  ;;  %v278_v49 = vld [vmem:[%s1224_s7 + $0x8] sm:$0xff]  ;;  %v1088_v53 = vld [vmem:[%s1234_s14 + $0xb4] ss:$8 sps:$4 sm:$0xff]   ;;  %p970_p9 = scmp.ne.s32.totalorder %s1138_s15, 1 }
  0x2b   : > { %v903_v48 = vcombine.high %v277_v47, %v277_v47  ;;  %v905_v52 = vcombine.high %v278_v49, %v278_v49  ;;  %v1090_v54 = vld [vmem:[%s1234_s14 + $0x1b4] ss:$8 sps:$4 sm:$0xff]   ;;  %v1092_v55 = vld [vmem:[%s1234_s14 + $0xb0] ss:$8 sps:$4 sm:$0xff]   ;;  %v1094_v57 = vld [vmem:[%s1234_s14 + $0xa4] ss:$8 sps:$4 sm:$0xff]   ;;  %v902_v5 = vcombine.low %v277_v47, %v277_v47  ;;  %v904_v6 = vcombine.low %v278_v49, %v278_v49 }
  0x2c   : > { %686 = vmatpush1.bf16.msra.mxu0 %v1044_v19  ;;  %v1093_v56 = vld [vmem:[%s1234_s14 + $0x1b0] ss:$8 sps:$4 sm:$0xff]   ;;  %v1096_v58 = vld [vmem:[%s1234_s14 + $0x1a4] ss:$8 sps:$4 sm:$0xff]   ;;  %v1098_v59 = vld [vmem:[%s1234_s14 + $0xa0] ss:$8 sps:$4 sm:$0xff]  }
  0x2d   : > { %727 = vmatpush1.bf16.msra.mxu1 %v1045_v20  ;;  %687 = vmatprep.subr.bf16.mxu0 %v1046_v21  ;;  %v1099_v60 = vld [vmem:[%s1234_s14 + $0x1a0] ss:$8 sps:$4 sm:$0xff]   ;;  %v1100_v61 = vld [vmem:[%s1234_s14 + $0x94] ss:$8 sps:$4 sm:$0xff]   ;;  %v1104_v63 = vld [vmem:[%s1234_s14 + $0x90] ss:$8 sps:$4 sm:$0xff]  }
  0x2e   : > { %728 = vmatprep.subr.bf16.mxu1 %v1048_v22  ;;  %709 = vmatprep.mubr.bf16.mxu0 %v903_v48  ;;  %v1102_v62 = vld [vmem:[%s1234_s14 + $0x194] ss:$8 sps:$4 sm:$0xff]   ;;  %v1105_v0 = vld [vmem:[%s1234_s14 + $0x190] ss:$8 sps:$4 sm:$0xff]   ;;  %v1106_v1 = vld [vmem:[%s1234_s14 + $0x84] ss:$8 sps:$4 sm:$0xff]  }
  0x2f   : > { %750 = vmatprep.mubr.bf16.mxu1 %v905_v52  ;;  %v1108_v2 = vld [vmem:[%s1234_s14 + $0x184] ss:$8 sps:$4 sm:$0xff]   ;;  %v1110_v3 = vld [vmem:[%s1234_s14 + $0x80] ss:$8 sps:$4 sm:$0xff]  }
  0x30   : > { %688 = vmatpush1.bf16.msra.mxu0 %v1050_v23  ;;  %v1111_v4 = vld [vmem:[%s1234_s14 + $0x180] ss:$8 sps:$4 sm:$0xff]  }
  0x31   : > { %729 = vmatpush1.bf16.msra.mxu1 %v1051_v24  ;;  %689 = vmatprep.subr.bf16.mxu0 %v1052_v25  ;;  %v275_v8 = vld [vmem:[#allocation2] sm:$0xff]  ;;  %v276_v12 = vld [vmem:[#allocation2 + $0x8] sm:$0xff] }
  0x32   : > { %730 = vmatprep.subr.bf16.mxu1 %v1054_v26 }
  0x34   : > { %690 = vmatpush1.bf16.msra.mxu0 %v1056_v27 }
  0x35   : > { %731 = vmatpush1.bf16.msra.mxu1 %v1057_v28  ;;  %691 = vmatprep.subr.bf16.mxu0 %v1058_v29 }
  0x36   : > { %732 = vmatprep.subr.bf16.mxu1 %v1060_v30 }
  0x38   : > { %692 = vmatpush1.bf16.msra.mxu0 %v1062_v31 }
  0x39   : > { %733 = vmatpush1.bf16.msra.mxu1 %v1063_v32  ;;  %693 = vmatprep.subr.bf16.mxu0 %v1064_v33 }
  0x3a   : > { %734 = vmatprep.subr.bf16.mxu1 %v1066_v34 }
  0x3c   : > { %694 = vmatpush2.bf16.msra.mxu0 %v1068_v35 }
  0x3d   : > { %735 = vmatpush2.bf16.msra.mxu1 %v1069_v36  ;;  %695 = vmatprep.subr.bf16.mxu0 %v1070_v37 }
  0x3e   : > { %736 = vmatprep.subr.bf16.mxu1 %v1072_v38 }
  0x40   : > { %696 = vmatpush2.bf16.msra.mxu0 %v1074_v39 }
  0x41   : > { %737 = vmatpush2.bf16.msra.mxu1 %v1075_v40  ;;  %697 = vmatprep.subr.bf16.mxu0 %v1076_v41 }
  0x42   : > { %738 = vmatprep.subr.bf16.mxu1 %v1078_v42 }
  0x44   : > { %698 = vmatpush2.bf16.msra.mxu0 %v1080_v43 }
  0x45   : > { %739 = vmatpush2.bf16.msra.mxu1 %v1081_v44  ;;  %699 = vmatprep.subr.bf16.mxu0 %v1082_v45 }
  0x46   : > { %740 = vmatprep.subr.bf16.mxu1 %v1084_v46 }
  0x48   : > { %700 = vmatpush2.bf16.msra.mxu0 %v1086_v50 }
  0x49   : > { %741 = vmatpush2.bf16.msra.mxu1 %v1087_v51  ;;  %701 = vmatprep.subr.bf16.mxu0 %v1088_v53 }
  0x4a   : > { %742 = vmatprep.subr.bf16.mxu1 %v1090_v54 }
  0x4c   : > { %702 = vmatpush2.bf16.msra.mxu0 %v1092_v55 }
  0x4d   : > { %743 = vmatpush2.bf16.msra.mxu1 %v1093_v56  ;;  %703 = vmatprep.subr.bf16.mxu0 %v1094_v57 }
  0x4e   : > { %744 = vmatprep.subr.bf16.mxu1 %v1096_v58 }
  0x50   : > { %704 = vmatpush2.bf16.msra.mxu0 %v1098_v59 }
  0x51   : > { %745 = vmatpush2.bf16.msra.mxu1 %v1099_v60  ;;  %705 = vmatprep.subr.bf16.mxu0 %v1100_v61 }
  0x52   : > { %746 = vmatprep.subr.bf16.mxu1 %v1102_v62 }
  0x54   : > { %706 = vmatpush2.bf16.msra.mxu0 %v1104_v63 }
  0x55   : > { %747 = vmatpush2.bf16.msra.mxu1 %v1105_v0  ;;  %707 = vmatprep.subr.bf16.mxu0 %v1106_v1 }
  0x56   : > { %748 = vmatprep.subr.bf16.mxu1 %v1108_v2 }
  0x58   : > { %708 = vmatpush2.bf16.msra.mxu0 %v1110_v3 }
  0x59   : > { %749 = vmatpush2.bf16.msra.mxu1 %v1111_v4 }
  0x5b   : > { %710 = vmatmul.mubr.bf16.vlgmr.msra.gmra.mxu0 %v902_v5 }
  0x5c   : > { %751 = vmatmul.mubr.bf16.vlgmr.msra.gmra.mxu1 %v904_v6 }
 0x11b   : > { %v711_v7 = vpop.f32.mrf.mxu0 }
 0x11c   : > { %v752_v9 = vpop.f32.mrf.mxu1 }
 0x11d   : > { %v753_v10 = vadd.f32 %v752_v9, %v711_v7  ;;  %v713_v11 = vpop.f32.mrf.mxu0 }
 0x11e   : > { %v754_v13 = vpop.f32.mrf.mxu1 }
 0x11f   : > { %v759_v14 = vadd.f32 %v753_v10, %v275_v8  ;;  %v755_v15 = vadd.f32 %v754_v13, %v713_v11  ;;  %v715_v16 = vpop.f32.mrf.mxu0  ;;  %766 = sbr.rel (%p970_p9) target bundleno = 447 (0x1bf), region = 44 }
 0x120   : > { %v756_v17 = vpop.f32.mrf.mxu1 }
 0x121   : > { %761 = vst [vmem:[#allocation2] sm:$0xff] %v759_v14  ;;  %v760_v18 = vadd.f32 %v755_v15, %v276_v12  ;;  %v716_v19 = vpop.f32.mrf.mxu0 }
 0x122   : > { %v757_v20 = vpop.f32.mrf.mxu1 }
 0x123   : > { %762 = vst [vmem:[#allocation2 + $0x8] sm:$0xff] %v760_v18 }
 0x124   : > { %v771_v21 = vlaneseq  ;;  %v769_v23 = vld [vmem:[%s1327_s2] sm:$0x3]  ;;  %v786_v33 = vld [vmem:[%s1219_s30 + $0x8] sm:$0xff] }
 0x125   : > { %v785_v32 = vld [vmem:[%s1219_s30] sm:$0xff] }
 0x126   : > { %v772_v22 = vshrl.u32 %v771_v21, 7 }
 0x128   : > { %v773_v24 = vsub.s32 0, %v772_v22  ;;  %v777_v25 = vsub.s32 1, %v772_v22  ;;  %v767_v26 = vld [vmem:[#allocation2] sm:$0xff] }
 0x12a   : > { %v768_v27 = vld [vmem:[#allocation2 + $0x8] sm:$0xff]  ;;  %v774_v28 = vrot.slane %v769_v23, %v773_v24  ;;  %v778_v29 = vrot.slane %v769_v23, %v777_v25 }
 0x12c   : > { %v781_v30 = vadd.f32 %v774_v28, %v767_v26  ;;  %v782_v31 = vadd.f32 %v778_v29, %v768_v27 }
 0x12e   : > { %v783_v34 = vmax.f32 %v781_v30, 0.0  ;;  %v784_v35 = vmax.f32 %v782_v31, 0.0 }
 0x130   : > { %v787_v36 = vmul.f32 %v785_v32, %v783_v34  ;;  %v788_v37 = vmul.f32 %v786_v33, %v784_v35 }
 0x132   : > { %v789_v38 = vadd.f32 %v788_v37, %v787_v36 }
 0x134   : > { %790 = vadd.xlane.f32.xlu0 %v789_v38 }
 0x1bd   : > { %v791_v39 = vpop.xlane.xlu0 %790 }
 0x1be   : > { %792 = vst [vmem:[%s1229_s10] sm:$0xff] %v791_v39 }
 0x1bf PF: > { %s14_s19 = sadd.s32 1, %s1154_s19   ;;  %s1330_s15 = smov %s1146_s17 }
 0x1c0   : > { %p11_p10 = scmp.ge.s32.totalorder %s14_s19, 6   ;;  %s1331_s16 = smov %s1150_s18 }
 0x1c1   : > { %s1332_s17 = smov %s1335_s20  ;;  %s1333_s18 = smov %s1339_s21 }
 0x1c2   :  { %13 = sbr.rel (!%p11_p10) target bundleno = 3 (0x3), region = 80 }

</bundles_post_ra>
